<compile_context>
chip_gen: v7x
topology: tpu7x:2x2x1
jax: 0.10.0
libtpu: 0.0.40
codegen_flags: <defaults>
</compile_context>

<pallas_src>
import jax
import jax.numpy as jnp
from jax.experimental import pallas as pl
from jax.experimental.pallas import tpu as pltpu

_SOBEL_X = ((-1.0, 0.0, 1.0), (-2.0, 0.0, 2.0), (-1.0, 0.0, 1.0))
_SOBEL_Y = ((-1.0, -2.0, -1.0), (0.0, 0.0, 0.0), (1.0, 2.0, 1.0))


def _baloss_kernel(d_ref, out_ref):
    """d_ref: (P, Hp, Wp) zero-padded, lane-packed difference planes (VMEM).
    out_ref: (1, 1, Wp) lane-dense partial sum for this grid step."""
    p, hp, wp = d_ref.shape

    def plane_partial(q, acc):
        d = d_ref[q].astype(jnp.float32)          # (hp, wp)
        dt = d[0:hp - 2, :]                       # row r-1
        dm = d[1:hp - 1, :]                       # row r
        db = d[2:hp, :]                           # row r+1
        vs = dt + 2.0 * dm + db                   # vertical [1,2,1]  -> Sobel_x
        vd = db - dt                              # vertical [-1,0,1] -> Sobel_y

        # Lane rolls go to the XLU.  Wrap-around only ever touches zero halo
        # columns (wp >= k*(w+2), one zero column per packed-plane side).
        def left(v):                              # v[:, c-1]
            return pltpu.roll(v, 1, axis=1)

        def right(v):                             # v[:, c+1] (roll by -1 mod wp)
            return pltpu.roll(v, wp - 1, axis=1)

        gx = right(vs) - left(vs)                 # Sobel_x * d
        gy = right(vd) + 2.0 * vd + left(vd)      # Sobel_y * d

        prod = jnp.abs(gx) * jnp.abs(gy) * jnp.abs(dm)
        return acc + jnp.sum(prod, axis=0, keepdims=True)   # (1, wp) partial

    acc = jax.lax.fori_loop(
        0, p, plane_partial, jnp.zeros((1, wp), jnp.float32),
        unroll=min(2, p))
    out_ref[0] = acc


def baloss(output, target):
    """output, target: (B, C, H, W) arrays. Returns the scalar mean loss."""
    b, c, h, w = output.shape
    n = b * c

    # --- tile geometry ------------------------------------------------------
    wp = pl.cdiv(w + 2, 128) * 128            # lane-aligned packed row width
    k = max(1, min(wp // (w + 2), n))         # planes packed per lane row
    hp = pl.cdiv(h + 2, 8) * 8                # sublane-aligned plane height
    m = pl.cdiv(n, k)                         # number of packed planes

    itemsize = jnp.dtype(output.dtype).itemsize
    plane_bytes = hp * wp * itemsize
    budget = 4 * 1024 * 1024                  # ~HBM-roofline-plateau block size
    p = max(1, min(m, budget // max(plane_bytes, 1)))
    if m >= 2:
        p = min(p, pl.cdiv(m, 2))             # g >= 2 -> both v7x TCs get work
    g = pl.cdiv(m, p)
    m_pad = g * p

    # --- wrapper pass: d = output - target, per-plane column halo, lane
    #     packing, sublane/lane alignment.  One fused elementwise+pad pass
    #     plus a small layout shuffle; the kernel then streams a single,
    #     lane-dense array (half the old HBM traffic, no lane waste). --------
    d = (output - target).reshape(n, h, w)
    d = jnp.pad(d, ((0, m_pad * k - n), (0, 0), (1, 1)))      # col halo / plane
    d = d.reshape(m_pad, k, h, w + 2).transpose(0, 2, 1, 3)   # pack k planes/row
    d = d.reshape(m_pad, h, k * (w + 2))
    d = jnp.pad(d, ((0, 0), (1, hp - h - 1), (0, wp - k * (w + 2))))

    # --- VMEM: double-buffered input block + f32 per-plane intermediates ----
    in_block = p * plane_bytes
    need = 2 * in_block + 8 * hp * wp * 4 + 2 * wp * 4
    vmem_limit = int(min(max(need + (2 << 20), 16 << 20), 48 << 20))

    partials = pl.pallas_call(
        _baloss_kernel,
        out_shape=jax.ShapeDtypeStruct((g, 1, wp), jnp.float32),
        grid_spec=pltpu.PrefetchScalarGridSpec(
            num_scalar_prefetch=0,
            grid=(g,),
            in_specs=[pl.BlockSpec((p, hp, wp), lambda i: (i, 0, 0))],
            out_specs=pl.BlockSpec((1, 1, wp), lambda i: (i, 0, 0)),
        ),
        compiler_params=pltpu.CompilerParams(
            dimension_semantics=("parallel",),
            vmem_limit_bytes=vmem_limit),
    )(d)

    total = jnp.sum(partials)                 # tiny (g, 1, wp) reduce in XLA
    return (total / (b * c * h * w)).astype(output.dtype)


def _baloss_reference(output, target):
    """Pure-JAX reference (mirrors the PyTorch module) for verification."""
    b, c, h, w = output.shape
    sx = jnp.array(_SOBEL_X, jnp.float32)
    sy = jnp.array(_SOBEL_Y, jnp.float32)
    wx = jnp.broadcast_to(sx, (c, 1, 3, 3))
    wy = jnp.broadcast_to(sy, (c, 1, 3, 3))

    def dwconv(x, kk):
        return jax.lax.conv_general_dilated(
            x, kk, window_strides=(1, 1), padding=((1, 1), (1, 1)),
            dimension_numbers=("NCHW", "OIHW", "NCHW"),
            feature_group_count=c)

    ix1 = dwconv(output, wx)
    ix2 = dwconv(target, wx)
    iy1 = dwconv(output, wy)
    iy2 = dwconv(target, wy)
    dx = jnp.abs(ix1 - ix2)
    dy = jnp.abs(iy1 - iy2)
    return jnp.mean(dx * dy * jnp.abs(target - output))


if __name__ == "__main__":
    key = jax.random.PRNGKey(0)
    k1, k2 = jax.random.split(key)
    B, C, H, W = 2, 4, 16, 16
    output = jax.random.normal(k1, (B, C, H, W), dtype=jnp.float32)
    target = jax.random.normal(k2, (B, C, H, W), dtype=jnp.float32)

    loss = jax.block_until_ready(jax.jit(baloss)(output, target))
    ref = jax.block_until_ready(_baloss_reference(output, target))

    assert jnp.isfinite(loss)
    rel_err = abs(float(loss) - float(ref)) / max(abs(float(ref)), 1e-12)
    assert rel_err < 1e-4, (float(loss), float(ref), rel_err)
    print("KERNEL_OK")
</pallas_src>

<mosaic_0001>
module attributes {stable_mosaic.version = 11 : i64} {
  func.func @_baloss_kernel(%arg0: i32, %arg1: memref<1x24x128xf32, #tpu.memory_space<vmem>>, %arg2: memref<1x1x128xf32, #tpu.memory_space<vmem>>) attributes {dimension_semantics = [#tpu.dimension_semantics<parallel>], iteration_bounds = array<i64: 2>, scalar_prefetch = 0 : i64, scratch_operands = 0 : i64, tpu.core_type = #tpu.core_type<tc>, window_params = [{transform_indices = @transform_0, window_bounds = array<i64: 1, 24, 128>}, {transform_indices = @transform_1, window_bounds = array<i64: 1, 1, 128>}]} {
    %cst = arith.constant 0.000000e+00 : f32
    %0 = vector.broadcast %cst : f32 to vector<1x128xf32>
    %c0_i32 = arith.constant 0 : i32
    %1 = arith.index_cast %c0_i32 : i32 to index
    %c0 = arith.constant 0 : index
    %c0_0 = arith.constant 0 : index
    %2 = vector.load %arg1[%1, %c0, %c0_0] : memref<1x24x128xf32, #tpu.memory_space<vmem>>, vector<1x24x128xf32>
    %3 = vector.shape_cast %2 : vector<1x24x128xf32> to vector<24x128xf32>
    %4 = vector.extract_strided_slice %3 {offsets = [0, 0], sizes = [22, 128], strides = [1, 1]} : vector<24x128xf32> to vector<22x128xf32>
    %5 = vector.extract_strided_slice %3 {offsets = [1, 0], sizes = [22, 128], strides = [1, 1]} : vector<24x128xf32> to vector<22x128xf32>
    %6 = vector.extract_strided_slice %3 {offsets = [2, 0], sizes = [22, 128], strides = [1, 1]} : vector<24x128xf32> to vector<22x128xf32>
    %cst_1 = arith.constant 2.000000e+00 : f32
    %7 = vector.broadcast %cst_1 : f32 to vector<22x128xf32>
    %8 = arith.mulf %7, %5 : vector<22x128xf32>
    %9 = arith.addf %4, %8 : vector<22x128xf32>
    %10 = arith.addf %9, %6 : vector<22x128xf32>
    %11 = arith.subf %6, %4 : vector<22x128xf32>
    %c127_i32 = arith.constant 127 : i32
    %12 = tpu.dynamic_rotate %10 by %c127_i32 dim 1 : vector<22x128xf32>, i32 -> vector<22x128xf32>
    %c1_i32 = arith.constant 1 : i32
    %13 = tpu.dynamic_rotate %10 by %c1_i32 dim 1 : vector<22x128xf32>, i32 -> vector<22x128xf32>
    %14 = arith.subf %12, %13 : vector<22x128xf32>
    %c127_i32_2 = arith.constant 127 : i32
    %15 = tpu.dynamic_rotate %11 by %c127_i32_2 dim 1 : vector<22x128xf32>, i32 -> vector<22x128xf32>
    %cst_3 = arith.constant 2.000000e+00 : f32
    %16 = vector.broadcast %cst_3 : f32 to vector<22x128xf32>
    %17 = arith.mulf %16, %11 : vector<22x128xf32>
    %18 = arith.addf %15, %17 : vector<22x128xf32>
    %c1_i32_4 = arith.constant 1 : i32
    %19 = tpu.dynamic_rotate %11 by %c1_i32_4 dim 1 : vector<22x128xf32>, i32 -> vector<22x128xf32>
    %20 = arith.addf %18, %19 : vector<22x128xf32>
    %21 = math.absf %14 : vector<22x128xf32>
    %22 = math.absf %20 : vector<22x128xf32>
    %23 = arith.mulf %21, %22 : vector<22x128xf32>
    %24 = math.absf %5 : vector<22x128xf32>
    %25 = arith.mulf %23, %24 : vector<22x128xf32>
    %cst_5 = arith.constant dense<0.000000e+00> : vector<128xf32>
    %26 = vector.multi_reduction <add>, %25, %cst_5 [0] : vector<22x128xf32> to vector<128xf32>
    %27 = vector.shape_cast %26 : vector<128xf32> to vector<1x128xf32>
    %28 = arith.addf %0, %27 : vector<1x128xf32>
    %c1_i32_6 = arith.constant 1 : i32
    %c0_7 = arith.constant 0 : index
    %c0_8 = arith.constant 0 : index
    %c0_9 = arith.constant 0 : index
    %29 = vector.load %arg2[%c0_7, %c0_8, %c0_9] : memref<1x1x128xf32, #tpu.memory_space<vmem>>, vector<1x1x128xf32>
    %30 = vector.shape_cast %29 : vector<1x1x128xf32> to vector<1x128xf32>
    %31 = vector.shape_cast %28 : vector<1x128xf32> to vector<1x1x128xf32>
    tpu.vector_store %arg2[%c0_7, %c0_8, %c0_9], %31 {strides = array<i32>} : memref<1x1x128xf32, #tpu.memory_space<vmem>>, vector<1x1x128xf32>,
    return
  }
  func.func @transform_0(%arg0: i32) -> (i32, i32, i32) {
    %c0_i32 = arith.constant 0 : i32
    %c0_i32_0 = arith.constant 0 : i32
    %c0_i32_1 = arith.constant 0 : i32
    return %arg0, %c0_i32, %c0_i32_0 : i32, i32, i32
  }
  func.func @transform_1(%arg0: i32) -> (i32, i32, i32) {
    %c0_i32 = arith.constant 0 : i32
    %c0_i32_0 = arith.constant 0 : i32
    %c0_i32_1 = arith.constant 0 : i32
    return %arg0, %c0_i32, %c0_i32_0 : i32, i32, i32
  }
}

</mosaic_0001>

<bundles_post_ra>
// kernel: sub.1
= control target key start
LH: loop header
LB: loop body
LE: loop exit
PB: predicated region body
PF: predicated region fallthrough
CT: control target
= control target key end

     0   :  { %3 = vsyncpa [#allocation1], 0  ;;  %s344_s0 = inlined_call_operand.hbm [shape: f32[2,4,16,16], index: 0, kind: input, shape index: {}]   ;;  %s345_s1 = inlined_call_operand.hbm [shape: f32[2,4,16,16], index: 1, kind: input, shape index: {}]   ;;  %s346_s2 = inlined_call_operand.vmem [shape: f32[2,4,16,16], index: 2, kind: output, shape index: {}]  }
   0x1   :  { %4 = vsyncpa [#allocation3], 0  ;;  %s253_s9 = smov [#allocation0]   ;;  %s205_s13 = scalar_lea.hbm %s344_s0, 2048 }
   0x2   :  { %s8_s10 = sshll.u32 %s253_s9, 4  ;;  %p206_p0 = scmp.ne.s32.totalorder %s344_s0, %s205_s13  ;;  %s9_s10 = int_to_ptr.vmem [resolvable:$true] %s8_s10 }
   0x3   :  { %p209_p1 = scmp.lt.u32.totalorder %s205_s13, %s344_s0 }
   0x5   :  { %p211_p2 = pnand %p209_p1, %p206_p0 }
   0x7   :  { %214 = shalt.err (!%p211_p2)
}
   0x8   :  { %s215_s18 = scalar_lea.vmem %s9_s10, 2048  ;;  %p220_p4 = scmp.lt.s32.totalorder %s9_s10, %s9_s10 }
   0x9   :  { %p216_p3 = scmp.ne.s32.totalorder %s9_s10, %s215_s18  ;;  %p221_p5 = scmp.lt.s32.totalorder %s215_s18, %s215_s18 }
   0xb   :  { %p222_p6 = por %p221_p5, %p220_p4 }
   0xd   :  { %p223_p7 = pnand %p222_p6, %p216_p3 }
   0xf   :  { %226 = shalt.err (!%p223_p7)
}
  0x10   :  { %s254_s19 = smov 128   ;;  %s255_s20 = smov 8  }
  0x11   :  { %14 = dma.hbm_to_vmem [thread:$0]  %s344_s0, 2048, %s9_s10, [#allocation1], %s254_s19, %s254_s19, %s255_s20  }
  0x12   :  { %s256_s0 = smov [#allocation2]   ;;  %s227_s26 = scalar_lea.hbm %s345_s1, 2048 }
  0x13   :  { %s18_s23 = sshll.u32 %s256_s0, 4  ;;  %p228_p8 = scmp.ne.s32.totalorder %s345_s1, %s227_s26  ;;  %s19_s23 = int_to_ptr.vmem [resolvable:$true] %s18_s23 }
  0x14   :  { %p231_p9 = scmp.lt.u32.totalorder %s227_s26, %s345_s1 }
  0x16   :  { %p233_p10 = pnand %p231_p9, %p228_p8 }
  0x18   :  { %236 = shalt.err (!%p233_p10)
}
  0x19   :  { %s237_s3 = scalar_lea.vmem %s19_s23, 2048  ;;  %p242_p12 = scmp.lt.s32.totalorder %s19_s23, %s19_s23 }
  0x1a   :  { %p238_p11 = scmp.ne.s32.totalorder %s19_s23, %s237_s3  ;;  %p243_p13 = scmp.lt.s32.totalorder %s237_s3, %s237_s3 }
  0x1c   :  { %p244_p0 = por %p243_p13, %p242_p12 }
  0x1e   :  { %p245_p1 = pnand %p244_p0, %p238_p11 }
  0x20   :  { %248 = shalt.err (!%p245_p1)
}
  0x21   :  { %24 = dma.hbm_to_vmem [thread:$0]  %s345_s1, 2048, %s19_s23, [#allocation3], %s254_s19, %s254_s19, %s255_s20  }
  0x22   :  { %249 = dma.done.wait [#allocation1], 2048  }
  0x23   :  { %250 = vsyncadd [#allocation1], 4294965248 }
  0x24   :  { %251 = dma.done.wait [#allocation3], 2048  }
  0x25   :  { %252 = vsyncadd [#allocation3], 4294965248  ;;  %v27_v0 = vld [vmem:[#allocation0] sm:$0xff]  ;;  %v45_v5 = vld [vmem:[#allocation0 + $0x10] sm:$0xff] }
  0x26   :  { %v28_v1 = vld [vmem:[#allocation2] sm:$0xff]  ;;  %v47_v6 = vld [vmem:[#allocation2 + $0x10] sm:$0xff]  ;;  %v105_v23 = vld [vmem:[#allocation0 + $0x8] sm:$0xff] }
  0x27   :  { %v35_v2 = vld [vmem:[#allocation0 + $0x40] sm:$0xff]  ;;  %v31_v3 = vsub.f32 %v27_v0, %v28_v1  ;;  %v50_v8 = vsub.f32 %v45_v5, %v47_v6  ;;  %v55_v9 = vld [vmem:[#allocation0 + $0x50] sm:$0xff]  ;;  %v107_v24 = vld [vmem:[#allocation2 + $0x8] sm:$0xff] }
  0x28   :  { %v37_v4 = vld [vmem:[#allocation2 + $0x40] sm:$0xff]  ;;  %v57_v10 = vld [vmem:[#allocation2 + $0x50] sm:$0xff]  ;;  %v110_v26 = vsub.f32 %v105_v23, %v107_v24  ;;  %v115_v27 = vld [vmem:[#allocation0 + $0x48] sm:$0xff] }
  0x29   :  { %v40_v7 = vsub.f32 %v35_v2, %v37_v4  ;;  %v65_v11 = vld [vmem:[#allocation0 + $0x20] sm:$0xff]  ;;  %33 = vst [vmem:[%s346_s2] sm:$0xff] %v31_v3  ;;  %v60_v12 = vsub.f32 %v55_v9, %v57_v10  ;;  %187 = vst [vmem:[%s346_s2 + $0x10] sm:$0xff] %v50_v8  ;;  %v85_v18 = vld [vmem:[#allocation0 + $0x30] sm:$0xff] }
  0x2a   :  { %v67_v13 = vld [vmem:[#allocation2 + $0x20] sm:$0xff]  ;;  %v87_v19 = vld [vmem:[#allocation2 + $0x30] sm:$0xff]  ;;  %v117_v28 = vld [vmem:[#allocation2 + $0x48] sm:$0xff]  ;;  %193 = vst [vmem:[%s346_s2 + $0x8] sm:$0xff] %v110_v26 }
  0x2b   :  { %v75_v14 = vld [vmem:[#allocation0 + $0x60] sm:$0xff]  ;;  %186 = vst [vmem:[%s346_s2 + $0x40] sm:$0xff] %v40_v7  ;;  %v70_v16 = vsub.f32 %v65_v11, %v67_v13  ;;  %v95_v20 = vld [vmem:[#allocation0 + $0x70] sm:$0xff]  ;;  %188 = vst [vmem:[%s346_s2 + $0x50] sm:$0xff] %v60_v12  ;;  %v90_v21 = vsub.f32 %v85_v18, %v87_v19  ;;  %v120_v30 = vsub.f32 %v115_v27, %v117_v28 }
  0x2c   :  { %v77_v15 = vld [vmem:[#allocation2 + $0x60] sm:$0xff]  ;;  %v97_v22 = vld [vmem:[#allocation2 + $0x70] sm:$0xff]  ;;  %v125_v29 = vld [vmem:[#allocation0 + $0x18] sm:$0xff] }
  0x2d   :  { %v80_v17 = vsub.f32 %v75_v14, %v77_v15  ;;  %189 = vst [vmem:[%s346_s2 + $0x20] sm:$0xff] %v70_v16  ;;  %v100_v25 = vsub.f32 %v95_v20, %v97_v22  ;;  %191 = vst [vmem:[%s346_s2 + $0x30] sm:$0xff] %v90_v21  ;;  %v127_v31 = vld [vmem:[#allocation2 + $0x18] sm:$0xff]  ;;  %v145_v36 = vld [vmem:[#allocation0 + $0x28] sm:$0xff] }
  0x2e   :  { %v135_v32 = vld [vmem:[#allocation0 + $0x58] sm:$0xff]  ;;  %v130_v34 = vsub.f32 %v125_v29, %v127_v31  ;;  %v147_v37 = vld [vmem:[#allocation2 + $0x28] sm:$0xff]  ;;  %194 = vst [vmem:[%s346_s2 + $0x48] sm:$0xff] %v120_v30 }
  0x2f   :  { %190 = vst [vmem:[%s346_s2 + $0x60] sm:$0xff] %v80_v17  ;;  %v137_v33 = vld [vmem:[#allocation2 + $0x58] sm:$0xff]  ;;  %192 = vst [vmem:[%s346_s2 + $0x70] sm:$0xff] %v100_v25  ;;  %v155_v38 = vld [vmem:[#allocation0 + $0x68] sm:$0xff]  ;;  %v150_v39 = vsub.f32 %v145_v36, %v147_v37 }
  0x30   :  { %v140_v35 = vsub.f32 %v135_v32, %v137_v33  ;;  %v157_v40 = vld [vmem:[#allocation2 + $0x68] sm:$0xff]  ;;  %v165_v41 = vld [vmem:[#allocation0 + $0x38] sm:$0xff]  ;;  %195 = vst [vmem:[%s346_s2 + $0x18] sm:$0xff] %v130_v34 }
  0x31   :  { %v167_v42 = vld [vmem:[#allocation2 + $0x38] sm:$0xff]  ;;  %v160_v43 = vsub.f32 %v155_v38, %v157_v40  ;;  %197 = vst [vmem:[%s346_s2 + $0x28] sm:$0xff] %v150_v39 }
  0x32   :  { %196 = vst [vmem:[%s346_s2 + $0x58] sm:$0xff] %v140_v35  ;;  %v170_v44 = vsub.f32 %v165_v41, %v167_v42  ;;  %v175_v45 = vld [vmem:[#allocation0 + $0x78] sm:$0xff] }
  0x33   :  { %v177_v46 = vld [vmem:[#allocation2 + $0x78] sm:$0xff]  ;;  %198 = vst [vmem:[%s346_s2 + $0x68] sm:$0xff] %v160_v43 }
  0x34   :  { %v180_v47 = vsub.f32 %v175_v45, %v177_v46  ;;  %199 = vst [vmem:[%s346_s2 + $0x38] sm:$0xff] %v170_v44 }
  0x36   :  { %200 = vst [vmem:[%s346_s2 + $0x78] sm:$0xff] %v180_v47 }
  0x37   :  { %184 = vsyncpa [#allocation1], 1 }
  0x38   :  { %185 = vsyncpa [#allocation3], 1 }

// kernel: baloss.1
= control target key start
LH: loop header
LB: loop body
LE: loop exit
PB: predicated region body
PF: predicated region fallthrough
CT: control target
= control target key end

     0   :  { %s342_s6 = smov 0   ;;  %s380_s0 = inlined_call_operand.vmem [shape: f32[2,24,128], index: 0, kind: input, shape index: {}]   ;;  %s381_s1 = inlined_call_operand.vmem [shape: f32[2,1,128], index: 1, kind: output, shape index: {}]  }
   0x1 LB: > { %s303_s7 = sadd.s32 4294967295, %s328_s6   ;;  %p307_p0 = scmp.ge.s32.totalorder %s328_s6, 1  ;;  %s328_s6 = sphi %s342_s6, %s11_s6  }
   0x2   : > { %p87_p1 = scmp.lt.s32.totalorder %s328_s6, 3 }
   0x4   : > { %p88_p2 = pnand %p307_p0, %p87_p1 }
   0x5   : > { %p105_p3 = scmp.lt.s32.totalorder (!%p88_p2), %s303_s7, 1  ;;  %vm149_vm0 = vcmask (!%p88_p2), 1041408   ;;  %vm137_vm1 = vcmask (!%p88_p2), 1045504   ;;  %vm122_vm2 = vcmask (!%p88_p2), 1046528   ;;  %s330_s12 = smov (!%p88_p2), 127  }
   0x6   : > { %91 = sbr.rel (%p88_p2) target bundleno = 185 (0xb9), region = 24  ;;  %s331_s13 = smov (!%p88_p2), 1  }
   0xd   : > { %s383_s7 = smov (!%p105_p3, %s303_s7), 1 }
   0xe   : > { %s311_s8 = smul.u32 24, %s383_s7  ;;  %s112_s16 = scalar_lea.vmem %s381_s1, %s383_s7 }
  0x10   : > { %s109_s11 = scalar_lea.vmem %s380_s0, %s311_s8 }
  0x11   : > { %v114_v0 = vld [vmem:[%s109_s11 + $0x8] sm:$0xff]  ;;  %v115_v1 = vld [vmem:[%s109_s11 + $0x10] sm:$0xff]  ;;  %v113_v2 = vld [vmem:[%s109_s11] sm:$0xff] }
  0x12   : > { %v151_v3 = vrot.slane %v114_v0, 6  ;;  %v153_v4 = vrot.slane %v115_v1, 6  ;;  %v150_v5 = vrot.slane %v113_v2, 6  ;;  %v118_v6 = vmul.f32 2.0, %v115_v1 }
  0x13   : > { %v116_v7 = vmul.f32 2.0, %v113_v2  ;;  %v117_v8 = vmul.f32 2.0, %v114_v0  ;;  %v141_v22 = vrot.slane %v115_v1, 2  ;;  %v138_v24 = vrot.slane %v113_v2, 2 }
  0x14   : > { %v154_v9 = vsel %vm149_vm0, %v151_v3, %v153_v4  ;;  %v152_v10 = vsel %vm149_vm0, %v150_v5, %v151_v3  ;;  %v158_v11 = vsub.f32 %v113_v2, %v150_v5  ;;  %v126_v12 = vrot.slane %v118_v6, 1 }
  0x15   : > { %v160_v13 = vsub.f32 %v115_v1, %v154_v9  ;;  %v159_v14 = vsub.f32 %v114_v0, %v152_v10  ;;  %v123_v16 = vrot.slane %v116_v7, 1  ;;  %v124_v17 = vrot.slane %v117_v8, 1 }
  0x16   : > { %v179_v15 = vrot.slane %v158_v11, 2  ;;  %v193_v18 = vmul.f32 2.0, %v158_v11  ;;  %v133_v21 = vadd.f32 %v126_v12, %v115_v1  ;;  %v139_v25 = vrot.slane %v114_v0, 2 }
  0x17   : > { %v182_v19 = vrot.slane %v160_v13, 2  ;;  %v180_v20 = vrot.slane %v159_v14, 2  ;;  %v195_v26 = vmul.f32 2.0, %v160_v13  ;;  %v125_v27 = vsel %vm122_vm2, %v123_v16, %v124_v17 }
  0x18   : > { %v194_v28 = vmul.f32 2.0, %v159_v14  ;;  %v199_v29 = vrot.slane %v193_v18, 2  ;;  %v127_v31 = vsel %vm122_vm2, %v124_v17, %v126_v12  ;;  %v228_v32 = vand.u32 2147483647, %v113_v2 }
  0x19   : > { %191 = vrot.lane.b32.xlu1 %v182_v19, %s330_s12  ;;  %v181_v23 = vsel %vm137_vm1, %v179_v15, %v180_v20  ;;  %v183_v30 = vsel %vm137_vm1, %v180_v20, %v182_v19  ;;  %v229_v33 = vand.u32 2147483647, %v114_v0  ;;  %v148_v34 = vadd.f32 %v141_v22, %v133_v21 }
  0x1a   : > { %187 = vrot.lane.b32.xlu0 %v181_v23, %s330_s12  ;;  %v202_v35 = vrot.slane %v195_v26, 2  ;;  %v200_v36 = vrot.slane %v194_v28, 2  ;;  %v131_v37 = vadd.f32 %v125_v27, %v113_v2  ;;  %v140_v38 = vsel %vm137_vm1, %v138_v24, %v139_v25 }
  0x1b   : > { %v234_v39 = vrot.slane %v228_v32, 1  ;;  %v235_v40 = vrot.slane %v229_v33, 1  ;;  %v132_v41 = vadd.f32 %v127_v31, %v114_v0  ;;  %v230_v44 = vand.u32 2147483647, %v115_v1 }
  0x1c   : > { %v201_v42 = vsel %vm137_vm1, %v199_v29, %v200_v36  ;;  %v203_v43 = vsel %vm137_vm1, %v200_v36, %v202_v35  ;;  %v142_v45 = vsel %vm137_vm1, %v139_v25, %v141_v22  ;;  %v146_v48 = vadd.f32 %v140_v38, %v131_v37 }
  0x1d   : > { %210 = vrot.lane.b32.xlu1 %v181_v23, %s331_s13  ;;  %v236_v46 = vsel %vm122_vm2, %v234_v39, %v235_v40  ;;  %v237_v47 = vrot.slane %v230_v44, 1  ;;  %v147_v49 = vadd.f32 %v142_v45, %v132_v41 }
  0x1e   : > { %189 = vrot.lane.b32.xlu0 %v183_v30, %s330_s12 }
  0x1f   : > { %v238_v50 = vsel %vm122_vm2, %v235_v40, %v237_v47 }
  0x21   : > { %165 = vrot.lane.b32.xlu1 %v148_v34, %s330_s12 }
  0x22   : > { %212 = vrot.lane.b32.xlu0 %v183_v30, %s331_s13 }
  0x25   : > { %161 = vrot.lane.b32.xlu1 %v146_v48, %s330_s12 }
  0x26   : > { %163 = vrot.lane.b32.xlu0 %v147_v49, %s330_s12 }
  0x29   : > { %167 = vrot.lane.b32.xlu1 %v146_v48, %s331_s13 }
  0x2a   : > { %169 = vrot.lane.b32.xlu0 %v147_v49, %s331_s13 }
  0x2d   : > { %214 = vrot.lane.b32.xlu1 %v182_v19, %s331_s13 }
  0x2e   : > { %171 = vrot.lane.b32.xlu0 %v148_v34, %s331_s13 }
  0x8b   : > { %v192_v51 = vpop.permute.xlu1 %191 }
  0x8c   : > { %v188_v52 = vpop.permute.xlu0 %187  ;;  %v209_v3 = vadd.f32 %v202_v35, %v192_v51 }
  0x8d   : > { %v207_v57 = vadd.f32 %v201_v42, %v188_v52 }
  0x8f   : > { %v211_v53 = vpop.permute.xlu1 %210 }
  0x90   : > { %v190_v54 = vpop.permute.xlu0 %189  ;;  %v216_v61 = vadd.f32 %v211_v53, %v207_v57 }
  0x91   : > { %v208_v60 = vadd.f32 %v203_v43, %v190_v54 }
  0x92   : > { %v222_v4 = vand.u32 2147483647, %v216_v61 }
  0x93   : > { %v166_v55 = vpop.permute.xlu1 %165 }
  0x94   : > { %v213_v56 = vpop.permute.xlu0 %212 }
  0x95   : > { %v217_v62 = vadd.f32 %v213_v56, %v208_v60 }
  0x97   : > { %v162_v58 = vpop.permute.xlu1 %161  ;;  %v223_v6 = vand.u32 2147483647, %v217_v62 }
  0x98   : > { %v164_v59 = vpop.permute.xlu0 %163 }
  0x9b   : > { %v168_v63 = vpop.permute.xlu1 %167 }
  0x9c   : > { %v173_v0 = vsub.f32 %v162_v58, %v168_v63  ;;  %v170_v1 = vpop.permute.xlu0 %169 }
  0x9d   : > { %v174_v2 = vsub.f32 %v164_v59, %v170_v1 }
  0x9e   : > { %v219_v5 = vand.u32 2147483647, %v173_v0 }
  0x9f   : > { %v220_v7 = vand.u32 2147483647, %v174_v2  ;;  %v215_v8 = vpop.permute.xlu1 %214 }
  0xa0   : > { %v225_v9 = vmul.f32 %v222_v4, %v219_v5  ;;  %v218_v10 = vadd.f32 %v215_v8, %v209_v3  ;;  %v172_v11 = vpop.permute.xlu0 %171 }
  0xa1   : > { %v226_v12 = vmul.f32 %v223_v6, %v220_v7  ;;  %v175_v13 = vsub.f32 %v166_v55, %v172_v11 }
  0xa2   : > { %v242_v14 = vmul.f32 %v236_v46, %v225_v9  ;;  %v224_v15 = vand.u32 2147483647, %v218_v10 }
  0xa3   : > { %v243_v16 = vmul.f32 %v238_v50, %v226_v12  ;;  %v221_v17 = vand.u32 2147483647, %v175_v13 }
  0xa5   : > { %v245_v18 = vadd.f32 %v243_v16, %v242_v14  ;;  %v227_v19 = vmul.f32 %v224_v15, %v221_v17 }
  0xa7   : > { %v244_v20 = vmul.f32 %v237_v47, %v227_v19 }
  0xa9   : > { %v246_v21 = vsel %vm137_vm1, %v244_v20, 0.0 }
  0xaa   : > { %v247_v22 = vadd.f32 %v246_v21, %v245_v18 }
  0xac   : > { %v248_v23 = vrot.slane %v247_v22, 4 }
  0xae   : > { %v249_v24 = vadd.f32 %v248_v23, %v247_v22 }
  0xb0   : > { %v250_v25 = vrot.slane %v249_v24, 2 }
  0xb2   : > { %v251_v26 = vadd.f32 %v250_v25, %v249_v24 }
  0xb4   : > { %v252_v27 = vrot.slane %v251_v26, 1 }
  0xb6   : > { %v253_v28 = vadd.f32 %v252_v27, %v251_v26 }
  0xb8   : > { %255 = vst [vmem:[%s112_s16] sm:$0x1] %v253_v28 }
  0xb9 PF: > { %s11_s6 = sadd.s32 1, %s328_s6  }
  0xba   : > { %p8_p4 = scmp.ge.s32.totalorder %s11_s6, 4  }
  0xbc   :  { %10 = sbr.rel (!%p8_p4) target bundleno = 1 (0x1), region = 54 }

</bundles_post_ra>
